<compile_context>
chip_gen: v5e
topology: v5e:2x2
jax: 0.10.0
libtpu: 0.0.40
codegen_flags: <defaults>
</compile_context>

<pallas_src>
import jax
import jax.numpy as jnp
from jax.experimental import pallas as pl
from jax.experimental.pallas import tpu as pltpu

_NOUT = 4          # (mu, v, alpha, beta)
_NOUT_PAD = 8      # padded to a full sublane group; extra rows are discarded


def _round_up(n, m):
    return ((n + m - 1) // m) * m


def _cast(a, dtype):
    return a if a.dtype == dtype else a.astype(dtype)


def evidential_kernel(x_ref, w1_ref, b1_ref, w2_ref, b2_ref, wot_ref, bo_ref,
                      out_ref):
    # Layer 1: (TB, D) @ (D, H1) -> (TB, H1), f32 accumulation on the MXU.
    h1 = jnp.dot(x_ref[...], w1_ref[...], preferred_element_type=jnp.float32)
    h1 = jnp.maximum(h1 + b1_ref[...], 0.0)

    # Layer 2.
    h1 = h1.astype(w2_ref.dtype)          # bf16 MXU inputs (no-op on the f32 path)
    h2 = jnp.dot(h1, w2_ref[...], preferred_element_type=jnp.float32)
    h2 = jnp.maximum(h2 + b2_ref[...], 0.0)

    # Output layer, transposed:  raw_t[o, b] = sum_k WoT[o, k] * h2[b, k]
    # -> (NOUT_PAD, TB): lane-dense epilogue + lane-dense (unmasked) stores.
    h2 = h2.astype(wot_ref.dtype)
    raw_t = jax.lax.dot_general(
        wot_ref[...], h2,
        dimension_numbers=(((1,), (1,)), ((), ())),
        preferred_element_type=jnp.float32)
    raw_t = raw_t + bo_ref[...]                                   # bo is (8, 1)

    # row 0 -> mu (identity); rows 1,2 -> 1 + softplus; row 3 -> softplus.
    row = jax.lax.broadcasted_iota(jnp.int32, raw_t.shape, 0)
    sp = jnp.maximum(raw_t, 0.0) + jnp.log1p(jnp.exp(-jnp.abs(raw_t)))
    offs = jnp.where((row == 1) | (row == 2), 1.0, 0.0)
    out_ref[...] = jnp.where(row == 0, raw_t, sp + offs)


def _choose_tile_b(batch, d, elem):
    """Batch tile: multiple of 128, >=2 grid steps for large B, VMEM-bounded."""
    tb = min(1024, max(128, _round_up(-(-batch // 2), 128)))
    budget = 10 * 1024 * 1024        # double-buffered x block + f32 activations
    while tb > 128 and (2 * tb * d * elem + 2 * tb * 128 * 4) > budget:
        tb = max(128, ((tb // 2) // 128) * 128)
    return tb


def evidential_forward(x, params, *, tile_b=None, use_bf16=True):
    """Fused EvidentialHead forward. Returns (mu, v, alpha, beta), each (B,1) f32."""
    w1, b1, w2, b2, wo, bo = params
    B, D = x.shape
    H1 = w1.shape[1]
    H2 = w2.shape[1]

    mm_dtype = jnp.bfloat16 if use_bf16 else jnp.float32
    elem = jnp.dtype(mm_dtype).itemsize

    # x goes straight to the kernel: no feature/batch padding passes in HBM.
    x_in = _cast(x, mm_dtype)
    w1_c = _cast(w1, mm_dtype)
    w2_c = _cast(w2, mm_dtype)
    wot_c = jnp.pad(_cast(wo, mm_dtype).T, ((0, _NOUT_PAD - _NOUT), (0, 0)))
    b1_c = _cast(b1, jnp.float32).reshape(1, H1)
    b2_c = _cast(b2, jnp.float32).reshape(1, H2)
    bo_c = jnp.pad(_cast(bo, jnp.float32).reshape(_NOUT, 1),
                   ((0, _NOUT_PAD - _NOUT), (0, 0)))

    if tile_b is None:
        tile_b = _choose_tile_b(B, D, elem)
    grid = (pl.cdiv(B, tile_b),)

    # Explicit VMEM budget (raises v5e's 16 MiB default, safely under every
    # generation's physical capacity incl. v7x's 64 MiB/TC).
    weight_bytes = (D * H1 + H1 * H2 + _NOUT_PAD * H2) * elem
    vmem_need = (2 * tile_b * D * elem                 # x block (double-buffered)
                 + 2 * tile_b * (H1 + H2) * 4          # f32 activations
                 + 2 * weight_bytes                    # weights (<=2 buffers)
                 + 2 * _NOUT_PAD * tile_b * 4          # output block
                 + (1 << 20))                          # slack
    vmem_limit = int(min(max(vmem_need, 32 * 1024 * 1024), 48 * 1024 * 1024))

    out_shape = jax.ShapeDtypeStruct((_NOUT_PAD, B), jnp.float32)
    cost = pl.CostEstimate(
        flops=2 * B * (D * H1 + H1 * H2 + H2 * _NOUT_PAD),
        transcendentals=2 * _NOUT_PAD * B,             # exp + log1p per lane
        bytes_accessed=(B * D * elem + weight_bytes
                        + (H1 + H2 + _NOUT_PAD) * 4 + _NOUT_PAD * B * 4),
    )

    def _run(single_buffer_weights):
        wkw = ({"pipeline_mode": pl.Buffered(1)} if single_buffer_weights else {})
        in_specs = [
            pl.BlockSpec((tile_b, D), lambda i: (i, 0)),             # x (streams)
            pl.BlockSpec((D, H1), lambda i: (0, 0), **wkw),          # W1 (resident)
            pl.BlockSpec((1, H1), lambda i: (0, 0), **wkw),          # b1
            pl.BlockSpec((H1, H2), lambda i: (0, 0), **wkw),         # W2
            pl.BlockSpec((1, H2), lambda i: (0, 0), **wkw),          # b2
            pl.BlockSpec((_NOUT_PAD, H2), lambda i: (0, 0), **wkw),  # Wo^T (padded)
            pl.BlockSpec((_NOUT_PAD, 1), lambda i: (0, 0), **wkw),   # bo (column)
        ]
        out_specs = pl.BlockSpec((_NOUT_PAD, tile_b), lambda i: (0, i))
        return pl.pallas_call(
            evidential_kernel,
            grid=grid,
            in_specs=in_specs,
            out_specs=out_specs,
            out_shape=out_shape,
            cost_estimate=cost,
            compiler_params=pltpu.CompilerParams(
                dimension_semantics=("parallel",),
                vmem_limit_bytes=vmem_limit),
        )(x_in, w1_c, b1_c, w2_c, b2_c, wot_c, bo_c)

    try:
        out_t = _run(True)       # single-buffered resident weights (saves VMEM)
    except Exception:
        out_t = _run(False)      # fallback if pipeline_mode=Buffered(1) unsupported

    return (out_t[0].reshape(B, 1), out_t[1].reshape(B, 1),
            out_t[2].reshape(B, 1), out_t[3].reshape(B, 1))


def init_params(key, in_dim, hidden=(128, 128)):
    """Deterministic synthetic parameters (weights stored as (in, out))."""
    params = []
    last = in_dim
    for h in list(hidden) + [_NOUT]:
        key, kw, kb = jax.random.split(key, 3)
        scale = 1.0 / jnp.sqrt(jnp.float32(last))
        w = jax.random.uniform(kw, (last, h), jnp.float32, -scale, scale)
        b = jax.random.uniform(kb, (1, h), jnp.float32, -scale, scale)
        params.extend([w, b])
        last = h
    return tuple(params)


def _reference(x, params):
    w1, b1, w2, b2, wo, bo = params
    hp = jax.lax.Precision.HIGHEST
    h1 = jnp.maximum(jnp.dot(x, w1, precision=hp) + b1, 0.0)
    h2 = jnp.maximum(jnp.dot(h1, w2, precision=hp) + b2, 0.0)
    raw = jnp.dot(h2, wo, precision=hp) + bo
    sp = jax.nn.softplus
    return (raw[:, 0:1], 1.0 + sp(raw[:, 1:2]), 1.0 + sp(raw[:, 2:3]),
            sp(raw[:, 3:4]))


if __name__ == "__main__":
    B, IN_DIM = 20, 32            # B not a tile multiple -> exercises the partial tail block
    HIDDEN = (128, 128)

    key = jax.random.PRNGKey(0)
    key, kx = jax.random.split(key)
    x = jax.random.normal(kx, (B, IN_DIM), jnp.float32)
    params = init_params(key, IN_DIM, HIDDEN)

    ref = _reference(x, params)

    # f32 MXU path (tight check).
    outs_f32 = evidential_forward(x, params, use_bf16=False)
    jax.block_until_ready(outs_f32)
    for got, want in zip(outs_f32, ref):
        assert got.shape == want.shape
        assert jnp.allclose(got, want, atol=2e-3, rtol=2e-3), \
            float(jnp.max(jnp.abs(got - want)))

    # Default bf16-input / f32-accumulation path (loose check).
    outs_bf16 = evidential_forward(x, params)
    jax.block_until_ready(outs_bf16)
    for got, want in zip(outs_bf16, ref):
        assert got.shape == want.shape
        assert bool(jnp.all(jnp.isfinite(got)))
        assert jnp.allclose(got, want, atol=1e-1, rtol=5e-2), \
            float(jnp.max(jnp.abs(got - want)))

    print("KERNEL_OK")
</pallas_src>

<mosaic_0001>
module attributes {stable_mosaic.version = 11 : i64} {
  func.func @evidential_kernel(%arg0: i32, %arg1: memref<128x32xf32, #tpu.memory_space<vmem>>, %arg2: memref<32x128xf32, #tpu.memory_space<vmem>>, %arg3: memref<1x128xf32, #tpu.memory_space<vmem>>, %arg4: memref<128x128xf32, #tpu.memory_space<vmem>>, %arg5: memref<1x128xf32, #tpu.memory_space<vmem>>, %arg6: memref<8x128xf32, #tpu.memory_space<vmem>>, %arg7: memref<8x1xf32, #tpu.memory_space<vmem>>, %arg8: memref<8x128xf32, #tpu.memory_space<vmem>>) attributes {dimension_semantics = [#tpu.dimension_semantics<parallel>], iteration_bounds = array<i64: 1>, scalar_prefetch = 0 : i64, scratch_operands = 0 : i64, tpu.core_type = #tpu.core_type<tc>, window_params = [{transform_indices = @transform_0, window_bounds = array<i64: 128, 32>}, {pipeline_mode = #tpu.pipeline_mode<synchronous>, transform_indices = @transform_1, window_bounds = array<i64: 32, 128>}, {pipeline_mode = #tpu.pipeline_mode<synchronous>, transform_indices = @transform_2, window_bounds = array<i64: 1, 128>}, {pipeline_mode = #tpu.pipeline_mode<synchronous>, transform_indices = @transform_3, window_bounds = array<i64: 128, 128>}, {pipeline_mode = #tpu.pipeline_mode<synchronous>, transform_indices = @transform_4, window_bounds = array<i64: 1, 128>}, {pipeline_mode = #tpu.pipeline_mode<synchronous>, transform_indices = @transform_5, window_bounds = array<i64: 8, 128>}, {pipeline_mode = #tpu.pipeline_mode<synchronous>, transform_indices = @transform_6, window_bounds = array<i64: 8, 1>}, {transform_indices = @transform_7, window_bounds = array<i64: 8, 128>}]} {
    %c0 = arith.constant 0 : index
    %c0_0 = arith.constant 0 : index
    %0 = vector.load %arg1[%c0, %c0_0] : memref<128x32xf32, #tpu.memory_space<vmem>>, vector<128x32xf32>
    %c0_1 = arith.constant 0 : index
    %c0_2 = arith.constant 0 : index
    %1 = vector.load %arg2[%c0_1, %c0_2] : memref<32x128xf32, #tpu.memory_space<vmem>>, vector<32x128xf32>
    %cst = arith.constant dense<0.000000e+00> : vector<128x128xf32>
    %2 = tpu.matmul %0, %1, %cst {dimension_numbers = #tpu.dot_dimension_numbers<[1], [0], [0], [1], [0, 0, 1, 1], [], []>} : vector<128x32xf32>, vector<32x128xf32>, vector<128x128xf32> -> vector<128x128xf32>
    %c0_3 = arith.constant 0 : index
    %c0_4 = arith.constant 0 : index
    %3 = vector.load %arg3[%c0_3, %c0_4] : memref<1x128xf32, #tpu.memory_space<vmem>>, vector<1x128xf32>
    %4 = vector.broadcast %3 : vector<1x128xf32> to vector<128x128xf32>
    %5 = arith.addf %2, %4 : vector<128x128xf32>
    %cst_5 = arith.constant 0.000000e+00 : f32
    %6 = vector.broadcast %cst_5 : f32 to vector<128x128xf32>
    %7 = arith.maximumf %5, %6 : vector<128x128xf32>
    %c0_6 = arith.constant 0 : index
    %c0_7 = arith.constant 0 : index
    %8 = vector.load %arg4[%c0_6, %c0_7] : memref<128x128xf32, #tpu.memory_space<vmem>>, vector<128x128xf32>
    %cst_8 = arith.constant dense<0.000000e+00> : vector<128x128xf32>
    %9 = tpu.matmul %7, %8, %cst_8 {dimension_numbers = #tpu.dot_dimension_numbers<[1], [0], [0], [1], [0, 0, 1, 1], [], []>} : vector<128x128xf32>, vector<128x128xf32>, vector<128x128xf32> -> vector<128x128xf32>
    %c0_9 = arith.constant 0 : index
    %c0_10 = arith.constant 0 : index
    %10 = vector.load %arg5[%c0_9, %c0_10] : memref<1x128xf32, #tpu.memory_space<vmem>>, vector<1x128xf32>
    %11 = vector.broadcast %10 : vector<1x128xf32> to vector<128x128xf32>
    %12 = arith.addf %9, %11 : vector<128x128xf32>
    %cst_11 = arith.constant 0.000000e+00 : f32
    %13 = vector.broadcast %cst_11 : f32 to vector<128x128xf32>
    %14 = arith.maximumf %12, %13 : vector<128x128xf32>
    %c0_12 = arith.constant 0 : index
    %c0_13 = arith.constant 0 : index
    %15 = vector.load %arg6[%c0_12, %c0_13] : memref<8x128xf32, #tpu.memory_space<vmem>>, vector<8x128xf32>
    %cst_14 = arith.constant dense<0.000000e+00> : vector<8x128xf32>
    %16 = tpu.matmul %15, %14, %cst_14 {dimension_numbers = #tpu.dot_dimension_numbers<[1], [1], [0], [0], [0, 0, 1, 0], [], []>} : vector<8x128xf32>, vector<128x128xf32>, vector<8x128xf32> -> vector<8x128xf32>
    %c0_15 = arith.constant 0 : index
    %c0_16 = arith.constant 0 : index
    %17 = vector.load %arg7[%c0_15, %c0_16] : memref<8x1xf32, #tpu.memory_space<vmem>>, vector<8x1xf32>
    %18 = vector.broadcast %17 : vector<8x1xf32> to vector<8x128xf32>
    %19 = arith.addf %16, %18 : vector<8x128xf32>
    %20 = tpu.iota {dimensions = array<i32: 0>} : vector<8x128xi32>
    %cst_17 = arith.constant 0.000000e+00 : f32
    %21 = vector.broadcast %cst_17 : f32 to vector<8x128xf32>
    %22 = arith.maximumf %19, %21 : vector<8x128xf32>
    %23 = math.absf %19 : vector<8x128xf32>
    %cst_18 = arith.constant 0.000000e+00 : f32
    %24 = vector.broadcast %cst_18 : f32 to vector<8x128xf32>
    %25 = arith.subf %24, %23 : vector<8x128xf32>
    %26 = math.exp %25 : vector<8x128xf32>
    %27 = math.log1p %26 : vector<8x128xf32>
    %28 = arith.addf %22, %27 : vector<8x128xf32>
    %c1_i32 = arith.constant 1 : i32
    %29 = vector.broadcast %c1_i32 : i32 to vector<8x128xi32>
    %30 = arith.cmpi eq, %20, %29 : vector<8x128xi32>
    %c2_i32 = arith.constant 2 : i32
    %31 = vector.broadcast %c2_i32 : i32 to vector<8x128xi32>
    %32 = arith.cmpi eq, %20, %31 : vector<8x128xi32>
    %33 = arith.ori %30, %32 : vector<8x128xi1>
    %cst_19 = arith.constant 1.000000e+00 : f32
    %cst_20 = arith.constant 0.000000e+00 : f32
    %34 = vector.broadcast %cst_19 : f32 to vector<8x128xf32>
    %35 = vector.broadcast %cst_20 : f32 to vector<8x128xf32>
    %36 = arith.select %33, %34, %35 : vector<8x128xi1>, vector<8x128xf32>
    %c0_i32 = arith.constant 0 : i32
    %37 = vector.broadcast %c0_i32 : i32 to vector<8x128xi32>
    %38 = arith.cmpi eq, %20, %37 : vector<8x128xi32>
    %39 = arith.addf %28, %36 : vector<8x128xf32>
    %40 = arith.select %38, %19, %39 : vector<8x128xi1>, vector<8x128xf32>
    %c0_21 = arith.constant 0 : index
    %c0_22 = arith.constant 0 : index
    %41 = vector.load %arg8[%c0_21, %c0_22] : memref<8x128xf32, #tpu.memory_space<vmem>>, vector<8x128xf32>
    tpu.vector_store %arg8[%c0_21, %c0_22], %40 {strides = array<i32>} : memref<8x128xf32, #tpu.memory_space<vmem>>, vector<8x128xf32>,
    return
  }
  func.func @transform_0(%arg0: i32) -> (i32, i32) {
    %c0_i32 = arith.constant 0 : i32
    %c0_i32_0 = arith.constant 0 : i32
    return %arg0, %c0_i32 : i32, i32
  }
  func.func @transform_1(%arg0: i32) -> (i32, i32) {
    %c0_i32 = arith.constant 0 : i32
    %c0_i32_0 = arith.constant 0 : i32
    %c0_i32_1 = arith.constant 0 : i32
    return %c0_i32, %c0_i32_0 : i32, i32
  }
  func.func @transform_2(%arg0: i32) -> (i32, i32) {
    %c0_i32 = arith.constant 0 : i32
    %c0_i32_0 = arith.constant 0 : i32
    %c0_i32_1 = arith.constant 0 : i32
    return %c0_i32, %c0_i32_0 : i32, i32
  }
  func.func @transform_3(%arg0: i32) -> (i32, i32) {
    %c0_i32 = arith.constant 0 : i32
    %c0_i32_0 = arith.constant 0 : i32
    %c0_i32_1 = arith.constant 0 : i32
    return %c0_i32, %c0_i32_0 : i32, i32
  }
  func.func @transform_4(%arg0: i32) -> (i32, i32) {
    %c0_i32 = arith.constant 0 : i32
    %c0_i32_0 = arith.constant 0 : i32
    %c0_i32_1 = arith.constant 0 : i32
    return %c0_i32, %c0_i32_0 : i32, i32
  }
  func.func @transform_5(%arg0: i32) -> (i32, i32) {
    %c0_i32 = arith.constant 0 : i32
    %c0_i32_0 = arith.constant 0 : i32
    %c0_i32_1 = arith.constant 0 : i32
    return %c0_i32, %c0_i32_0 : i32, i32
  }
  func.func @transform_6(%arg0: i32) -> (i32, i32) {
    %c0_i32 = arith.constant 0 : i32
    %c0_i32_0 = arith.constant 0 : i32
    %c0_i32_1 = arith.constant 0 : i32
    return %c0_i32, %c0_i32_0 : i32, i32
  }
  func.func @transform_7(%arg0: i32) -> (i32, i32) {
    %c0_i32 = arith.constant 0 : i32
    %c0_i32_0 = arith.constant 0 : i32
    return %c0_i32, %arg0 : i32, i32
  }
}

module attributes {stable_mosaic.version = 11 : i64} {
  func.func @evidential_kernel(%arg0: i32, %arg1: memref<128x32xf32, #tpu.memory_space<vmem>>, %arg2: memref<32x128xf32, #tpu.memory_space<vmem>>, %arg3: memref<1x128xf32, #tpu.memory_space<vmem>>, %arg4: memref<128x128xf32, #tpu.memory_space<vmem>>, %arg5: memref<1x128xf32, #tpu.memory_space<vmem>>, %arg6: memref<8x128xf32, #tpu.memory_space<vmem>>, %arg7: memref<8x1xf32, #tpu.memory_space<vmem>>, %arg8: memref<8x128xf32, #tpu.memory_space<vmem>>) attributes {dimension_semantics = [#tpu.dimension_semantics<parallel>], iteration_bounds = array<i64: 1>, scalar_prefetch = 0 : i64, scratch_operands = 0 : i64, tpu.core_type = #tpu.core_type<tc>, window_params = [{transform_indices = @transform_0, window_bounds = array<i64: 128, 32>}, {pipeline_mode = #tpu.pipeline_mode<synchronous>, transform_indices = @transform_1, window_bounds = array<i64: 32, 128>}, {pipeline_mode = #tpu.pipeline_mode<synchronous>, transform_indices = @transform_2, window_bounds = array<i64: 1, 128>}, {pipeline_mode = #tpu.pipeline_mode<synchronous>, transform_indices = @transform_3, window_bounds = array<i64: 128, 128>}, {pipeline_mode = #tpu.pipeline_mode<synchronous>, transform_indices = @transform_4, window_bounds = array<i64: 1, 128>}, {pipeline_mode = #tpu.pipeline_mode<synchronous>, transform_indices = @transform_5, window_bounds = array<i64: 8, 128>}, {pipeline_mode = #tpu.pipeline_mode<synchronous>, transform_indices = @transform_6, window_bounds = array<i64: 8, 1>}, {transform_indices = @transform_7, window_bounds = array<i64: 8, 128>}]} {
    %c0 = arith.constant 0 : index
    %c0_0 = arith.constant 0 : index
    %0 = vector.load %arg1[%c0, %c0_0] : memref<128x32xf32, #tpu.memory_space<vmem>>, vector<128x32xf32>
    %c0_1 = arith.constant 0 : index
    %c0_2 = arith.constant 0 : index
    %1 = vector.load %arg2[%c0_1, %c0_2] : memref<32x128xf32, #tpu.memory_space<vmem>>, vector<32x128xf32>
    %cst = arith.constant dense<0.000000e+00> : vector<128x128xf32>
    %2 = tpu.matmul %0, %1, %cst {dimension_numbers = #tpu.dot_dimension_numbers<[1], [0], [0], [1], [0, 0, 1, 1], [], []>} : vector<128x32xf32>, vector<32x128xf32>, vector<128x128xf32> -> vector<128x128xf32>
    %c0_3 = arith.constant 0 : index
    %c0_4 = arith.constant 0 : index
    %3 = vector.load %arg3[%c0_3, %c0_4] : memref<1x128xf32, #tpu.memory_space<vmem>>, vector<1x128xf32>
    %4 = vector.broadcast %3 : vector<1x128xf32> to vector<128x128xf32>
    %5 = arith.addf %2, %4 : vector<128x128xf32>
    %cst_5 = arith.constant 0.000000e+00 : f32
    %6 = vector.broadcast %cst_5 : f32 to vector<128x128xf32>
    %7 = arith.maximumf %5, %6 : vector<128x128xf32>
    %c0_6 = arith.constant 0 : index
    %c0_7 = arith.constant 0 : index
    %8 = vector.load %arg4[%c0_6, %c0_7] : memref<128x128xf32, #tpu.memory_space<vmem>>, vector<128x128xf32>
    %cst_8 = arith.constant dense<0.000000e+00> : vector<128x128xf32>
    %9 = tpu.matmul %7, %8, %cst_8 {dimension_numbers = #tpu.dot_dimension_numbers<[1], [0], [0], [1], [0, 0, 1, 1], [], []>} : vector<128x128xf32>, vector<128x128xf32>, vector<128x128xf32> -> vector<128x128xf32>
    %c0_9 = arith.constant 0 : index
    %c0_10 = arith.constant 0 : index
    %10 = vector.load %arg5[%c0_9, %c0_10] : memref<1x128xf32, #tpu.memory_space<vmem>>, vector<1x128xf32>
    %11 = vector.broadcast %10 : vector<1x128xf32> to vector<128x128xf32>
    %12 = arith.addf %9, %11 : vector<128x128xf32>
    %cst_11 = arith.constant 0.000000e+00 : f32
    %13 = vector.broadcast %cst_11 : f32 to vector<128x128xf32>
    %14 = arith.maximumf %12, %13 : vector<128x128xf32>
    %c0_12 = arith.constant 0 : index
    %c0_13 = arith.constant 0 : index
    %15 = vector.load %arg6[%c0_12, %c0_13] : memref<8x128xf32, #tpu.memory_space<vmem>>, vector<8x128xf32>
    %cst_14 = arith.constant dense<0.000000e+00> : vector<8x128xf32>
    %16 = tpu.matmul %15, %14, %cst_14 {dimension_numbers = #tpu.dot_dimension_numbers<[1], [1], [0], [0], [0, 0, 1, 0], [], []>} : vector<8x128xf32>, vector<128x128xf32>, vector<8x128xf32> -> vector<8x128xf32>
    %c0_15 = arith.constant 0 : index
    %c0_16 = arith.constant 0 : index
    %17 = vector.load %arg7[%c0_15, %c0_16] : memref<8x1xf32, #tpu.memory_space<vmem>>, vector<8x1xf32>
    %18 = vector.broadcast %17 : vector<8x1xf32> to vector<8x128xf32>
    %19 = arith.addf %16, %18 : vector<8x128xf32>
    %20 = tpu.iota {dimensions = array<i32: 0>} : vector<8x128xi32>
    %cst_17 = arith.constant 0.000000e+00 : f32
    %21 = vector.broadcast %cst_17 : f32 to vector<8x128xf32>
    %22 = arith.maximumf %19, %21 : vector<8x128xf32>
    %23 = math.absf %19 : vector<8x128xf32>
    %cst_18 = arith.constant 0.000000e+00 : f32
    %24 = vector.broadcast %cst_18 : f32 to vector<8x128xf32>
    %25 = arith.subf %24, %23 : vector<8x128xf32>
    %26 = math.exp %25 : vector<8x128xf32>
    %27 = math.log1p %26 : vector<8x128xf32>
    %28 = arith.addf %22, %27 : vector<8x128xf32>
    %c1_i32 = arith.constant 1 : i32
    %29 = vector.broadcast %c1_i32 : i32 to vector<8x128xi32>
    %30 = arith.cmpi eq, %20, %29 : vector<8x128xi32>
    %c2_i32 = arith.constant 2 : i32
    %31 = vector.broadcast %c2_i32 : i32 to vector<8x128xi32>
    %32 = arith.cmpi eq, %20, %31 : vector<8x128xi32>
    %33 = arith.ori %30, %32 : vector<8x128xi1>
    %cst_19 = arith.constant 1.000000e+00 : f32
    %cst_20 = arith.constant 0.000000e+00 : f32
    %34 = vector.broadcast %cst_19 : f32 to vector<8x128xf32>
    %35 = vector.broadcast %cst_20 : f32 to vector<8x128xf32>
    %36 = arith.select %33, %34, %35 : vector<8x128xi1>, vector<8x128xf32>
    %c0_i32 = arith.constant 0 : i32
    %37 = vector.broadcast %c0_i32 : i32 to vector<8x128xi32>
    %38 = arith.cmpi eq, %20, %37 : vector<8x128xi32>
    %39 = arith.addf %28, %36 : vector<8x128xf32>
    %40 = arith.select %38, %19, %39 : vector<8x128xi1>, vector<8x128xf32>
    %c0_21 = arith.constant 0 : index
    %c0_22 = arith.constant 0 : index
    %41 = vector.load %arg8[%c0_21, %c0_22] : memref<8x128xf32, #tpu.memory_space<vmem>>, vector<8x128xf32>
    tpu.vector_store %arg8[%c0_21, %c0_22], %40 {strides = array<i32>} : memref<8x128xf32, #tpu.memory_space<vmem>>, vector<8x128xf32>,
    return
  }
  func.func @transform_0(%arg0: i32) -> (i32, i32) {
    %c0_i32 = arith.constant 0 : i32
    %c0_i32_0 = arith.constant 0 : i32
    return %arg0, %c0_i32 : i32, i32
  }
  func.func @transform_1(%arg0: i32) -> (i32, i32) {
    %c0_i32 = arith.constant 0 : i32
    %c0_i32_0 = arith.constant 0 : i32
    %c0_i32_1 = arith.constant 0 : i32
    return %c0_i32, %c0_i32_0 : i32, i32
  }
  func.func @transform_2(%arg0: i32) -> (i32, i32) {
    %c0_i32 = arith.constant 0 : i32
    %c0_i32_0 = arith.constant 0 : i32
    %c0_i32_1 = arith.constant 0 : i32
    return %c0_i32, %c0_i32_0 : i32, i32
  }
  func.func @transform_3(%arg0: i32) -> (i32, i32) {
    %c0_i32 = arith.constant 0 : i32
    %c0_i32_0 = arith.constant 0 : i32
    %c0_i32_1 = arith.constant 0 : i32
    return %c0_i32, %c0_i32_0 : i32, i32
  }
  func.func @transform_4(%arg0: i32) -> (i32, i32) {
    %c0_i32 = arith.constant 0 : i32
    %c0_i32_0 = arith.constant 0 : i32
    %c0_i32_1 = arith.constant 0 : i32
    return %c0_i32, %c0_i32_0 : i32, i32
  }
  func.func @transform_5(%arg0: i32) -> (i32, i32) {
    %c0_i32 = arith.constant 0 : i32
    %c0_i32_0 = arith.constant 0 : i32
    %c0_i32_1 = arith.constant 0 : i32
    return %c0_i32, %c0_i32_0 : i32, i32
  }
  func.func @transform_6(%arg0: i32) -> (i32, i32) {
    %c0_i32 = arith.constant 0 : i32
    %c0_i32_0 = arith.constant 0 : i32
    %c0_i32_1 = arith.constant 0 : i32
    return %c0_i32, %c0_i32_0 : i32, i32
  }
  func.func @transform_7(%arg0: i32) -> (i32, i32) {
    %c0_i32 = arith.constant 0 : i32
    %c0_i32_0 = arith.constant 0 : i32
    return %c0_i32, %arg0 : i32, i32
  }
}

</mosaic_0001>

<bundles_post_ra>
// kernel: tpu_custom_call.1
= control target key start
LH: loop header
LB: loop body
LE: loop exit
PB: predicated region body
PF: predicated region fallthrough
CT: control target
= control target key end

     0   :  { %12 = vsyncpa [#allocation3], 0  ;;  %s639_s0 = inlined_call_operand.hbm [shape: f32[20,32], index: 0, kind: input, shape index: {}]   ;;  %s640_s1 = inlined_call_operand.hbm [shape: f32[32,128], index: 1, kind: input, shape index: {}]   ;;  %s641_s2 = inlined_call_operand.vmem [shape: f32[1,128], index: 2, kind: input, shape index: {}]   ;;  %s642_s3 = inlined_call_operand.hbm [shape: f32[128,128], index: 3, kind: input, shape index: {}]   ;;  %s643_s4 = inlined_call_operand.vmem [shape: f32[1,128], index: 4, kind: input, shape index: {}]   ;;  %s644_s5 = inlined_call_operand.vmem [shape: f32[8,128], index: 5, kind: input, shape index: {}]   ;;  %s645_s6 = inlined_call_operand.vmem [shape: f32[8,1], index: 6, kind: input, shape index: {}]   ;;  %s646_s7 = inlined_call_operand.hbm [shape: f32[8,20], index: 7, kind: output, shape index: {}]  }
   0x1   :  { %13 = vsyncpa [#allocation6], 0 }
   0x2   :  { %14 = vsyncpa [#allocation4], 0 }
   0x3   :  { %18 = vsyncadd [#allocation3], 1664  ;;  %s32_s26 = sshll.u32 %s640_s1, 4  ;;  %s548_s27 = smov [#allocation5]   ;;  %s33_s26 = int_to_ptr.hbm [resolvable:$true] %s32_s26 }
   0x4   :  { %s34_s28 = sshll.u32 %s548_s27, 4  ;;  %s19_s8 = sshll.u32 %s639_s0, 4  ;;  %s35_s28 = int_to_ptr.vmem [resolvable:$true] %s34_s28  ;;  %s20_s8 = int_to_ptr.hbm [resolvable:$true] %s19_s8 }
   0x5   :  { %s549_s9 = smov 128   ;;  %s550_s10 = smov 8  }
   0x6   :  { %40 = dma.hbm_to_vmem [thread:$0]  %s33_s26, 512, %s35_s28, [#allocation6], %s549_s9, %s549_s9, %s550_s10  }
   0x7   :  { %s551_s11 = smov [#allocation2]   ;;  %s47_s15 = sshll.u32 %s642_s3, 4  ;;  %s48_s15 = int_to_ptr.hbm [resolvable:$true] %s47_s15 }
   0x8   :  { %s21_s12 = sshll.u32 %s551_s11, 4  ;;  %s552_s1 = smov [#allocation7]   ;;  %s22_s12 = int_to_ptr.vmem [resolvable:$true] %s21_s12 }
   0x9   :  { %27 = dma.hbm_to_vmem [thread:$0]  %s20_s8, 384, %s22_s12, [#allocation3], %s549_s9, %s549_s9, %s550_s10  }
   0xa   :  { %s49_s16 = sshll.u32 %s552_s1, 4  ;;  %s50_s16 = int_to_ptr.vmem [resolvable:$true] %s49_s16 }
   0xb   :  { %55 = dma.hbm_to_vmem [thread:$0]  %s48_s15, 2048, %s50_s16, [#allocation6], %s549_s9, %s549_s9, %s550_s10  }
   0xc   :  { %542 = dma.done.wait [#allocation3], 2048  }
   0xd   :  { %543 = vsyncadd [#allocation3], 4294965248 }
   0xe   :  { %544 = dma.done.wait [#allocation6], 2560  }
   0xf   :  { %545 = vsyncadd [#allocation6], 4294964736  ;;  %v93_v0 = vld [vmem:[#allocation5 + $0x18] sm:$0xff]  ;;  %v92_v1 = vld [vmem:[#allocation5 + $0x10] sm:$0xff]  ;;  %vm98_vm0 = vcmask 261120   ;;  %s388_s23 = sshll.u32 %s646_s7, 4  ;;  %s389_s23 = int_to_ptr.hbm [resolvable:$true] %s388_s23 }
  0x10   :  { %159 = vmatpush.msra.mxu0 %v93_v0  ;;  %v91_v2 = vld [vmem:[#allocation5 + $0x8] sm:$0xff]  ;;  %v90_v3 = vld [vmem:[#allocation5] sm:$0xff]  ;;  %v76_v6 = vld [vmem:[#allocation2 + $0x10] sm:$0xff] }
  0x11   :  { %v74_v4 = vld [vmem:[#allocation2] sm:$0xff]  ;;  %v75_v5 = vld [vmem:[#allocation2 + $0x8] sm:$0xff]  ;;  %v77_v7 = vld [vmem:[#allocation2 + $0x18] sm:$0xff] }
  0x12   :  { %160 = vmatpush.msra.mxu0 %v92_v1  ;;  %v78_v8 = vld [vmem:[#allocation2 + $0x20] sm:$0xff]  ;;  %v79_v9 = vld [vmem:[#allocation2 + $0x28] sm:$0xff]  ;;  %v80_v10 = vld [vmem:[#allocation2 + $0x30] sm:$0xff] }
  0x13   :  { %v81_v11 = vld [vmem:[#allocation2 + $0x38] sm:$0xff]  ;;  %v82_v12 = vld [vmem:[#allocation2 + $0x40] sm:$0xff]  ;;  %v242_v14 = vld [vmem:[#allocation7 + $0x70] sm:$0xff] }
  0x14   :  { %161 = vmatpush.msra.mxu0 %v91_v2  ;;  %v243_v13 = vld [vmem:[#allocation7 + $0x78] sm:$0xff]  ;;  %v241_v15 = vld [vmem:[#allocation7 + $0x68] sm:$0xff]  ;;  %v240_v17 = vld [vmem:[#allocation7 + $0x60] sm:$0xff] }
  0x15   :  { %248 = vmatpush.msra.mxu1 %v243_v13  ;;  %415 = vmatpush.msra.mxu3 %v243_v13  ;;  %v83_v16 = vld [vmem:[#allocation2 + $0x48] sm:$0xff]  ;;  %v239_v18 = vld [vmem:[#allocation7 + $0x58] sm:$0xff]  ;;  %v238_v19 = vld [vmem:[#allocation7 + $0x50] sm:$0xff] }
  0x16   :  { %162 = vmatpush.msra.mxu0 %v90_v3  ;;  %v237_v20 = vld [vmem:[#allocation7 + $0x48] sm:$0xff]  ;;  %v84_v21 = vld [vmem:[#allocation2 + $0x50] sm:$0xff]  ;;  %v236_v22 = vld [vmem:[#allocation7 + $0x40] sm:$0xff] }
  0x17   :  { %399 = vmatmul.msk.f32.vlgmr.msra.gmra.mxu0 %vm98_vm0, %v74_v4  ;;  %249 = vmatpush.msra.mxu1 %v242_v14  ;;  %v235_v23 = vld [vmem:[#allocation7 + $0x38] sm:$0xff]  ;;  %v234_v24 = vld [vmem:[#allocation7 + $0x30] sm:$0xff]  ;;  %v233_v25 = vld [vmem:[#allocation7 + $0x28] sm:$0xff] }
  0x18   :  { %416 = vmatpush.msra.mxu3 %v242_v14  ;;  %v85_v26 = vld [vmem:[#allocation2 + $0x58] sm:$0xff]  ;;  %v232_v27 = vld [vmem:[#allocation7 + $0x20] sm:$0xff]  ;;  %v230_v29 = vld [vmem:[#allocation7 + $0x10] sm:$0xff] }
  0x19   :  { %250 = vmatpush.msra.mxu1 %v241_v15  ;;  %v231_v28 = vld [vmem:[#allocation7 + $0x18] sm:$0xff]  ;;  %v86_v30 = vld [vmem:[#allocation2 + $0x60] sm:$0xff]  ;;  %v229_v31 = vld [vmem:[#allocation7 + $0x8] sm:$0xff] }
  0x1a   :  { %417 = vmatpush.msra.mxu3 %v241_v15  ;;  %v228_v32 = vld [vmem:[#allocation7] sm:$0xff]  ;;  %v87_v33 = vld [vmem:[#allocation2 + $0x68] sm:$0xff]  ;;  %v88_v34 = vld [vmem:[#allocation2 + $0x70] sm:$0xff] }
  0x1b   :  { %251 = vmatpush.msra.mxu1 %v240_v17  ;;  %v89_v35 = vld [vmem:[#allocation2 + $0x78] sm:$0xff]  ;;  %v440_v36 = vld [vmem:[%s641_s2] ss:$0 sm:$0xff] }
  0x1c   :  { %418 = vmatpush.msra.mxu3 %v240_v17 }
  0x1d   :  { %252 = vmatpush.msra.mxu1 %v239_v18 }
  0x1e   :  { %419 = vmatpush.msra.mxu3 %v239_v18 }
  0x1f   :  { %400 = vmatmul.msk.f32.gmra.mxu0 %vm98_vm0, %v75_v5  ;;  %253 = vmatpush.msra.mxu1 %v238_v19 }
  0x20   :  { %420 = vmatpush.msra.mxu3 %v238_v19 }
  0x21   :  { %254 = vmatpush.msra.mxu1 %v237_v20 }
  0x22   :  { %421 = vmatpush.msra.mxu3 %v237_v20 }
  0x23   :  { %255 = vmatpush.msra.mxu1 %v236_v22 }
  0x24   :  { %422 = vmatpush.msra.mxu3 %v236_v22 }
  0x25   :  { %256 = vmatpush.msra.mxu1 %v235_v23 }
  0x26   :  { %423 = vmatpush.msra.mxu3 %v235_v23 }
  0x27   :  { %401 = vmatmul.msk.f32.gmra.mxu0 %vm98_vm0, %v76_v6  ;;  %257 = vmatpush.msra.mxu1 %v234_v24 }
  0x28   :  { %424 = vmatpush.msra.mxu3 %v234_v24 }
  0x29   :  { %258 = vmatpush.msra.mxu1 %v233_v25 }
  0x2a   :  { %425 = vmatpush.msra.mxu3 %v233_v25 }
  0x2b   :  { %259 = vmatpush.msra.mxu1 %v232_v27 }
  0x2c   :  { %426 = vmatpush.msra.mxu3 %v232_v27 }
  0x2d   :  { %260 = vmatpush.msra.mxu1 %v231_v28 }
  0x2e   :  { %427 = vmatpush.msra.mxu3 %v231_v28 }
  0x2f   :  { %402 = vmatmul.msk.f32.gmra.mxu0 %vm98_vm0, %v77_v7  ;;  %261 = vmatpush.msra.mxu1 %v230_v29 }
  0x30   :  { %428 = vmatpush.msra.mxu3 %v230_v29 }
  0x31   :  { %262 = vmatpush.msra.mxu1 %v229_v31 }
  0x32   :  { %429 = vmatpush.msra.mxu3 %v229_v31 }
  0x33   :  { %263 = vmatpush.msra.mxu1 %v228_v32 }
  0x34   :  { %430 = vmatpush.msra.mxu3 %v228_v32 }
  0x37   :  { %403 = vmatmul.msk.f32.gmra.mxu0 %vm98_vm0, %v78_v8 }
  0x3f   :  { %404 = vmatmul.msk.f32.gmra.mxu0 %vm98_vm0, %v79_v9 }
  0x47   :  { %405 = vmatmul.msk.f32.gmra.mxu0 %vm98_vm0, %v80_v10 }
  0x4f   :  { %406 = vmatmul.msk.f32.gmra.mxu0 %vm98_vm0, %v81_v11 }
  0x57   :  { %407 = vmatmul.msk.f32.gmra.mxu0 %vm98_vm0, %v82_v12 }
  0x5f   :  { %408 = vmatmul.msk.f32.gmra.mxu0 %vm98_vm0, %v83_v16 }
  0x67   :  { %409 = vmatmul.msk.f32.gmra.mxu0 %vm98_vm0, %v84_v21 }
  0x6f   :  { %410 = vmatmul.msk.f32.gmra.mxu0 %vm98_vm0, %v85_v26 }
  0x77   :  { %411 = vmatmul.msk.f32.gmra.mxu0 %vm98_vm0, %v86_v30 }
  0x7f   :  { %412 = vmatmul.msk.f32.gmra.mxu0 %vm98_vm0, %v87_v33  ;;  %v441_v33 = vld [vmem:[%s643_s4] ss:$0 sm:$0xff] }
  0x87   :  { %413 = vmatmul.msk.f32.gmra.mxu0 %vm98_vm0, %v88_v34 }
  0x8f   :  { %414 = vmatmul.msk.f32.gmra.mxu0 %vm98_vm0, %v89_v35 }
  0x94   :  { %v164_v37 = vpop.f32.mrf.mxu0 }
  0x95   :  { %v165_v38 = vadd.f32 %v440_v36, %v164_v37 }
  0x97   :  { %v212_v39 = vmax.f32 %v165_v38, 0.0 }
  0x99   :  { %264 = vmatmul.f32.vlgmr.msra.gmra.mxu1 %v212_v39 }
  0x9c   :  { %v167_v40 = vpop.f32.mrf.mxu0 }
  0x9d   :  { %v168_v41 = vadd.f32 %v440_v36, %v167_v40 }
  0x9f   :  { %v213_v42 = vmax.f32 %v168_v41, 0.0 }
  0xa1   :  { %267 = vmatmul.f32.gmra.mxu1 %v213_v42 }
  0xa4   :  { %v170_v43 = vpop.f32.mrf.mxu0 }
  0xa5   :  { %v171_v44 = vadd.f32 %v440_v36, %v170_v43 }
  0xa7   :  { %v214_v45 = vmax.f32 %v171_v44, 0.0 }
  0xa9   :  { %270 = vmatmul.f32.gmra.mxu1 %v214_v45 }
  0xac   :  { %v173_v46 = vpop.f32.mrf.mxu0 }
  0xad   :  { %v174_v47 = vadd.f32 %v440_v36, %v173_v46 }
  0xaf   :  { %v215_v48 = vmax.f32 %v174_v47, 0.0 }
  0xb1   :  { %273 = vmatmul.f32.gmra.mxu1 %v215_v48 }
  0xb4   :  { %v176_v49 = vpop.f32.mrf.mxu0 }
  0xb5   :  { %v177_v50 = vadd.f32 %v440_v36, %v176_v49 }
  0xb7   :  { %v216_v51 = vmax.f32 %v177_v50, 0.0 }
  0xb9   :  { %276 = vmatmul.f32.gmra.mxu1 %v216_v51 }
  0xbc   :  { %v179_v52 = vpop.f32.mrf.mxu0 }
  0xbd   :  { %v180_v53 = vadd.f32 %v440_v36, %v179_v52 }
  0xbf   :  { %v217_v54 = vmax.f32 %v180_v53, 0.0 }
  0xc1   :  { %279 = vmatmul.f32.gmra.mxu1 %v217_v54 }
  0xc4   :  { %v182_v55 = vpop.f32.mrf.mxu0 }
  0xc5   :  { %v183_v56 = vadd.f32 %v440_v36, %v182_v55 }
  0xc7   :  { %v218_v57 = vmax.f32 %v183_v56, 0.0 }
  0xc9   :  { %282 = vmatmul.f32.gmra.mxu1 %v218_v57  ;;  %v330_v57 = vld [vmem:[%s645_s6] sm:$0xff] }
  0xcc   :  { %v185_v58 = vpop.f32.mrf.mxu0 }
  0xcd   :  { %v186_v59 = vadd.f32 %v440_v36, %v185_v58  ;;  %v553_v58 = vmov 0  }
  0xce   :  { %439 = vset.pattern.permute.xlu0 %v553_v58 }
  0xcf   :  { %v219_v60 = vmax.f32 %v186_v59, 0.0  ;;  %333 = vperm.xlu0 %439, %v330_v57  }
  0xd1   :  { %285 = vmatmul.f32.gmra.mxu1 %v219_v60 }
  0xd4   :  { %v188_v61 = vpop.f32.mrf.mxu0 }
  0xd5   :  { %v189_v62 = vadd.f32 %v440_v36, %v188_v61 }
  0xd7   :  { %v220_v63 = vmax.f32 %v189_v62, 0.0 }
  0xd9   :  { %288 = vmatmul.f32.gmra.mxu1 %v220_v63 }
  0xdc   :  { %v191_v0 = vpop.f32.mrf.mxu0 }
  0xdd   :  { %v192_v1 = vadd.f32 %v440_v36, %v191_v0 }
  0xdf   :  { %v221_v2 = vmax.f32 %v192_v1, 0.0 }
  0xe1   :  { %291 = vmatmul.f32.vlgmr.msra.gmra.mxu3 %v221_v2 }
  0xe4   :  { %v194_v3 = vpop.f32.mrf.mxu0 }
  0xe5   :  { %v195_v4 = vadd.f32 %v440_v36, %v194_v3 }
  0xe7   :  { %v222_v5 = vmax.f32 %v195_v4, 0.0 }
  0xe9   :  { %294 = vmatmul.f32.gmra.mxu3 %v222_v5 }
  0xec   :  { %v197_v6 = vpop.f32.mrf.mxu0 }
  0xed   :  { %v198_v7 = vadd.f32 %v440_v36, %v197_v6 }
  0xef   :  { %v223_v8 = vmax.f32 %v198_v7, 0.0 }
  0xf1   :  { %297 = vmatmul.f32.gmra.mxu3 %v223_v8  ;;  %v329_v8 = vld [vmem:[%s644_s5] sm:$0xff]  ;;  %s555_s5 = smov [#allocation8]  }
  0xf2   :  { %s386_s20 = sshll.u32 %s555_s5, 4  ;;  %s387_s20 = int_to_ptr.vmem [resolvable:$true] %s386_s20 }
  0xf4   :  { %v200_v9 = vpop.f32.mrf.mxu0 }
  0xf5   :  { %v201_v10 = vadd.f32 %v440_v36, %v200_v9 }
  0xf7   :  { %v224_v11 = vmax.f32 %v201_v10, 0.0 }
  0xf9   :  { %300 = vmatmul.f32.gmra.mxu3 %v224_v11 }
  0xfc   :  { %v203_v12 = vpop.f32.mrf.mxu0 }
  0xfd   :  { %v204_v13 = vadd.f32 %v440_v36, %v203_v12 }
  0xff   :  { %v225_v14 = vmax.f32 %v204_v13, 0.0 }
 0x101   :  { %303 = vmatmul.f32.gmra.mxu3 %v225_v14 }
 0x104   :  { %v206_v15 = vpop.f32.mrf.mxu0 }
 0x105   :  { %v207_v16 = vadd.f32 %v440_v36, %v206_v15  ;;  %v356_v15 = vlaneseq }
 0x107   :  { %v226_v17 = vmax.f32 %v207_v16, 0.0 }
 0x109   :  { %306 = vmatmul.f32.gmra.mxu3 %v226_v17 }
 0x10c   :  { %v209_v18 = vpop.f32.mrf.mxu0 }
 0x10d   :  { %v210_v19 = vadd.f32 %v440_v36, %v209_v18 }
 0x10f   :  { %v227_v20 = vmax.f32 %v210_v19, 0.0  ;;  %v357_v19 = vshrl.u32 %v356_v15, 7 }
 0x111   :  { %309 = vmatmul.f32.gmra.mxu3 %v227_v20  ;;  %vm373_vm1 = vcmp.eq.s32.totalorder %v357_v19, 1  ;;  %vm374_vm2 = vcmp.eq.s32.totalorder %v357_v19, 2  ;;  %vm377_vm5 = vcmp.eq.s32.totalorder %v357_v19, 0 }
 0x112   :  { %vm375_vm3 = vmor %vm373_vm1, %vm374_vm2 }
 0x116   :  { %v624_v21 = vpop.f32.mrf.mxu1 }
 0x117   :  { %v266_v5 = vadd.f32 %v441_v33, %v624_v21 }
 0x119   :  { %v313_v7 = vmax.f32 %v266_v5, 0.0 }
 0x11e   :  { %v268_v23 = vpop.f32.mrf.mxu1 }
 0x11f   :  { %v269_v3 = vadd.f32 %v441_v33, %v268_v23 }
 0x121   :  { %v314_v6 = vmax.f32 %v269_v3, 0.0 }
 0x126   :  { %v271_v25 = vpop.f32.mrf.mxu1 }
 0x127   :  { %v272_v1 = vadd.f32 %v441_v33, %v271_v25 }
 0x129   :  { %v315_v4 = vmax.f32 %v272_v1, 0.0 }
 0x12e   :  { %v274_v27 = vpop.f32.mrf.mxu1 }
 0x12f   :  { %v275_v63 = vadd.f32 %v441_v33, %v274_v27  ;;  %v554_v27 = vmov 0.0  }
 0x131   :  { %v316_v2 = vmax.f32 %v275_v63, 0.0 }
 0x136   :  { %v277_v29 = vpop.f32.mrf.mxu1 }
 0x137   :  { %v278_v61 = vadd.f32 %v441_v33, %v277_v29 }
 0x139   :  { %v317_v0 = vmax.f32 %v278_v61, 0.0 }
 0x13e   :  { %v280_v32 = vpop.f32.mrf.mxu1 }
 0x13f   :  { %v281_v59 = vadd.f32 %v441_v33, %v280_v32 }
 0x141   :  { %v318_v62 = vmax.f32 %v281_v59, 0.0  ;;  %v334_v9 = vpop.permute.xlu0 %333 }
 0x146   :  { %v283_v38 = vpop.f32.mrf.mxu1 }
 0x147   :  { %v284_v55 = vadd.f32 %v441_v33, %v283_v38 }
 0x149   :  { %v319_v60 = vmax.f32 %v284_v55, 0.0 }
 0x14e   :  { %v286_v43 = vpop.f32.mrf.mxu1 }
 0x14f   :  { %v287_v53 = vadd.f32 %v441_v33, %v286_v43 }
 0x151   :  { %v320_v56 = vmax.f32 %v287_v53, 0.0 }
 0x156   :  { %v289_v50 = vpop.f32.mrf.mxu1 }
 0x157   :  { %v290_v51 = vadd.f32 %v441_v33, %v289_v50 }
 0x159   :  { %v321_v54 = vmax.f32 %v290_v51, 0.0 }
 0x164   :  { %v292_v22 = vpop.f32.mrf.mxu3 }
 0x165   :  { %v293_v48 = vadd.f32 %v441_v33, %v292_v22 }
 0x167   :  { %v322_v52 = vmax.f32 %v293_v48, 0.0 }
 0x16c   :  { %v295_v24 = vpop.f32.mrf.mxu3 }
 0x16d   :  { %v296_v46 = vadd.f32 %v441_v33, %v295_v24 }
 0x16f   :  { %v323_v49 = vmax.f32 %v296_v46, 0.0 }
 0x174   :  { %v298_v26 = vpop.f32.mrf.mxu3 }
 0x175   :  { %v299_v44 = vadd.f32 %v441_v33, %v298_v26 }
 0x177   :  { %v324_v47 = vmax.f32 %v299_v44, 0.0 }
 0x17c   :  { %v301_v28 = vpop.f32.mrf.mxu3 }
 0x17d   :  { %v302_v41 = vadd.f32 %v441_v33, %v301_v28  ;;  %v376_v28 = vsel %vm375_vm3, 1.0, %v554_v27 }
 0x17f   :  { %v325_v45 = vmax.f32 %v302_v41, 0.0 }
 0x184   :  { %v304_v30 = vpop.f32.mrf.mxu3 }
 0x185   :  { %v305_v39 = vadd.f32 %v441_v33, %v304_v30 }
 0x187   :  { %v326_v42 = vmax.f32 %v305_v39, 0.0 }
 0x18c   :  { %v307_v31 = vpop.f32.mrf.mxu3 }
 0x18d   :  { %v308_v36 = vadd.f32 %v441_v33, %v307_v31 }
 0x18f   :  { %v327_v40 = vmax.f32 %v308_v36, 0.0 }
 0x194   :  { %v310_v34 = vpop.f32.mrf.mxu3 }
 0x195   :  { %v311_v35 = vadd.f32 %v441_v33, %v310_v34 }
 0x197   :  { %v328_v37 = vmax.f32 %v311_v35, 0.0 }
 0x199   :  { %336 = vmatpush.xpose.msra.mxu2 %v328_v37 }
 0x19d   :  { %337 = vmatpush.xpose.msra.mxu2 %v327_v40 }
 0x1a1   :  { %338 = vmatpush.xpose.msra.mxu2 %v326_v42 }
 0x1a5   :  { %339 = vmatpush.xpose.msra.mxu2 %v325_v45 }
 0x1a9   :  { %340 = vmatpush.xpose.msra.mxu2 %v324_v47 }
 0x1ad   :  { %341 = vmatpush.xpose.msra.mxu2 %v323_v49 }
 0x1b1   :  { %342 = vmatpush.xpose.msra.mxu2 %v322_v52 }
 0x1b5   :  { %343 = vmatpush.xpose.msra.mxu2 %v321_v54 }
 0x1b9   :  { %344 = vmatpush.xpose.msra.mxu2 %v320_v56 }
 0x1bd   :  { %345 = vmatpush.xpose.msra.mxu2 %v319_v60 }
 0x1c1   :  { %346 = vmatpush.xpose.msra.mxu2 %v318_v62 }
 0x1c5   :  { %347 = vmatpush.xpose.msra.mxu2 %v317_v0 }
 0x1c9   :  { %348 = vmatpush.xpose.msra.mxu2 %v316_v2 }
 0x1cd   :  { %349 = vmatpush.xpose.msra.mxu2 %v315_v4 }
 0x1d1   :  { %350 = vmatpush.xpose.msra.mxu2 %v314_v6 }
 0x1d5   :  { %351 = vmatpush.xpose.msra.mxu2 %v313_v7 }
 0x1d8   :  { %352 = vmatmul.f32.vlgmr.msra.gmra.mxu2 %v329_v8 }
 0x25b   :  { %v353_v10 = vpop.f32.mrf.mxu2 }
 0x25c   :  { %v354_v11 = vadd.f32 %v353_v10, %v334_v9 }
 0x25e   :  { %v359_v12 = vand.u32 2147483647, %v354_v11  ;;  %v358_v25 = vmax.f32 %v354_v11, 0.0 }
 0x260   :  { %v360_v13 = vsub.f32 0.0, %v359_v12 }
 0x262   :  { %v361_v14 = vmul.f32 1.442695, %v360_v13 }
 0x264   :  { %442 = vpow2.f32 %v361_v14 }
 0x26a   :  { %v443_v16 = vpop.eup %442 }
 0x26b   :  { %v363_v17 = vadd.f32 1.0, %v443_v16  ;;  %v366_v18 = vmul.f32 -0.5, %v443_v16  ;;  %v369_v21 = vand.u32 2147483647, %v443_v16 }
 0x26d   :  { %444 = vlog2.f32 %v363_v17  ;;  %v367_v20 = vadd.f32 1.0, %v366_v18  ;;  %vm370_vm4 = vcmp.lt.f32.partialorder %v369_v21, 0.0004427343 }
 0x26f   :  { %v368_v24 = vmul.f32 %v443_v16, %v367_v20 }
 0x273   :  { %v445_v22 = vpop.eup %444 }
 0x274   :  { %v365_v23 = vmul.f32 0.6931472, %v445_v22 }
 0x276   :  { %v371_v26 = vsel %vm370_vm4, %v368_v24, %v365_v23 }
 0x277   :  { %v372_v29 = vadd.f32 %v371_v26, %v358_v25 }
 0x279   :  { %v378_v30 = vadd.f32 %v376_v28, %v372_v29 }
 0x27b   :  { %v379_v31 = vsel %vm377_vm5, %v354_v11, %v378_v30 }
 0x27c   :  { %380 = vst [vmem:[#allocation8] sm:$0xff] %v379_v31 }
 0x27d   :  { %391 = dma.vmem_to_hbm [thread:$0]  %s387_s20, 128, %s389_s23, [#allocation4]  }
 0x27e   :  { %546 = dma.done.wait [#allocation4], 128  }
 0x27f   :  { %547 = vsyncadd [#allocation4], 4294967168 }
 0x280   :  { %396 = vsyncpa [#allocation3], 1 }
 0x281   :  { %397 = vsyncpa [#allocation6], 1 }
 0x282   :  { %398 = vsyncpa [#allocation4], 1 }

// kernel: tpu_custom_call.1
= control target key start
LH: loop header
LB: loop body
LE: loop exit
PB: predicated region body
PF: predicated region fallthrough
CT: control target
= control target key end

     0   :  { %12 = vsyncpa [#allocation3], 0  ;;  %s639_s0 = inlined_call_operand.hbm [shape: f32[20,32], index: 0, kind: input, shape index: {}]   ;;  %s640_s1 = inlined_call_operand.hbm [shape: f32[32,128], index: 1, kind: input, shape index: {}]   ;;  %s641_s2 = inlined_call_operand.vmem [shape: f32[1,128], index: 2, kind: input, shape index: {}]   ;;  %s642_s3 = inlined_call_operand.hbm [shape: f32[128,128], index: 3, kind: input, shape index: {}]   ;;  %s643_s4 = inlined_call_operand.vmem [shape: f32[1,128], index: 4, kind: input, shape index: {}]   ;;  %s644_s5 = inlined_call_operand.vmem [shape: f32[8,128], index: 5, kind: input, shape index: {}]   ;;  %s645_s6 = inlined_call_operand.vmem [shape: f32[8,1], index: 6, kind: input, shape index: {}]   ;;  %s646_s7 = inlined_call_operand.hbm [shape: f32[8,20], index: 7, kind: output, shape index: {}]  }
   0x1   :  { %13 = vsyncpa [#allocation6], 0 }
   0x2   :  { %14 = vsyncpa [#allocation4], 0 }
   0x3   :  { %18 = vsyncadd [#allocation3], 1664  ;;  %s32_s26 = sshll.u32 %s640_s1, 4  ;;  %s548_s27 = smov [#allocation5]   ;;  %s33_s26 = int_to_ptr.hbm [resolvable:$true] %s32_s26 }
   0x4   :  { %s34_s28 = sshll.u32 %s548_s27, 4  ;;  %s19_s8 = sshll.u32 %s639_s0, 4  ;;  %s35_s28 = int_to_ptr.vmem [resolvable:$true] %s34_s28  ;;  %s20_s8 = int_to_ptr.hbm [resolvable:$true] %s19_s8 }
   0x5   :  { %s549_s9 = smov 128   ;;  %s550_s10 = smov 8  }
   0x6   :  { %40 = dma.hbm_to_vmem [thread:$0]  %s33_s26, 512, %s35_s28, [#allocation6], %s549_s9, %s549_s9, %s550_s10  }
   0x7   :  { %s551_s11 = smov [#allocation2]   ;;  %s47_s15 = sshll.u32 %s642_s3, 4  ;;  %s48_s15 = int_to_ptr.hbm [resolvable:$true] %s47_s15 }
   0x8   :  { %s21_s12 = sshll.u32 %s551_s11, 4  ;;  %s552_s1 = smov [#allocation7]   ;;  %s22_s12 = int_to_ptr.vmem [resolvable:$true] %s21_s12 }
   0x9   :  { %27 = dma.hbm_to_vmem [thread:$0]  %s20_s8, 384, %s22_s12, [#allocation3], %s549_s9, %s549_s9, %s550_s10  }
   0xa   :  { %s49_s16 = sshll.u32 %s552_s1, 4  ;;  %s50_s16 = int_to_ptr.vmem [resolvable:$true] %s49_s16 }
   0xb   :  { %55 = dma.hbm_to_vmem [thread:$0]  %s48_s15, 2048, %s50_s16, [#allocation6], %s549_s9, %s549_s9, %s550_s10  }
   0xc   :  { %542 = dma.done.wait [#allocation3], 2048  }
   0xd   :  { %543 = vsyncadd [#allocation3], 4294965248 }
   0xe   :  { %544 = dma.done.wait [#allocation6], 2560  }
   0xf   :  { %545 = vsyncadd [#allocation6], 4294964736  ;;  %v93_v0 = vld [vmem:[#allocation5 + $0x18] sm:$0xff]  ;;  %v92_v1 = vld [vmem:[#allocation5 + $0x10] sm:$0xff]  ;;  %vm98_vm0 = vcmask 261120   ;;  %s388_s23 = sshll.u32 %s646_s7, 4  ;;  %s389_s23 = int_to_ptr.hbm [resolvable:$true] %s388_s23 }
  0x10   :  { %159 = vmatpush.msra.mxu0 %v93_v0  ;;  %v91_v2 = vld [vmem:[#allocation5 + $0x8] sm:$0xff]  ;;  %v90_v3 = vld [vmem:[#allocation5] sm:$0xff]  ;;  %v76_v6 = vld [vmem:[#allocation2 + $0x10] sm:$0xff] }
  0x11   :  { %v74_v4 = vld [vmem:[#allocation2] sm:$0xff]  ;;  %v75_v5 = vld [vmem:[#allocation2 + $0x8] sm:$0xff]  ;;  %v77_v7 = vld [vmem:[#allocation2 + $0x18] sm:$0xff] }
  0x12   :  { %160 = vmatpush.msra.mxu0 %v92_v1  ;;  %v78_v8 = vld [vmem:[#allocation2 + $0x20] sm:$0xff]  ;;  %v79_v9 = vld [vmem:[#allocation2 + $0x28] sm:$0xff]  ;;  %v80_v10 = vld [vmem:[#allocation2 + $0x30] sm:$0xff] }
  0x13   :  { %v81_v11 = vld [vmem:[#allocation2 + $0x38] sm:$0xff]  ;;  %v82_v12 = vld [vmem:[#allocation2 + $0x40] sm:$0xff]  ;;  %v242_v14 = vld [vmem:[#allocation7 + $0x70] sm:$0xff] }
  0x14   :  { %161 = vmatpush.msra.mxu0 %v91_v2  ;;  %v243_v13 = vld [vmem:[#allocation7 + $0x78] sm:$0xff]  ;;  %v241_v15 = vld [vmem:[#allocation7 + $0x68] sm:$0xff]  ;;  %v240_v17 = vld [vmem:[#allocation7 + $0x60] sm:$0xff] }
  0x15   :  { %248 = vmatpush.msra.mxu1 %v243_v13  ;;  %415 = vmatpush.msra.mxu3 %v243_v13  ;;  %v83_v16 = vld [vmem:[#allocation2 + $0x48] sm:$0xff]  ;;  %v239_v18 = vld [vmem:[#allocation7 + $0x58] sm:$0xff]  ;;  %v238_v19 = vld [vmem:[#allocation7 + $0x50] sm:$0xff] }
  0x16   :  { %162 = vmatpush.msra.mxu0 %v90_v3  ;;  %v237_v20 = vld [vmem:[#allocation7 + $0x48] sm:$0xff]  ;;  %v84_v21 = vld [vmem:[#allocation2 + $0x50] sm:$0xff]  ;;  %v236_v22 = vld [vmem:[#allocation7 + $0x40] sm:$0xff] }
  0x17   :  { %399 = vmatmul.msk.f32.vlgmr.msra.gmra.mxu0 %vm98_vm0, %v74_v4  ;;  %249 = vmatpush.msra.mxu1 %v242_v14  ;;  %v235_v23 = vld [vmem:[#allocation7 + $0x38] sm:$0xff]  ;;  %v234_v24 = vld [vmem:[#allocation7 + $0x30] sm:$0xff]  ;;  %v233_v25 = vld [vmem:[#allocation7 + $0x28] sm:$0xff] }
  0x18   :  { %416 = vmatpush.msra.mxu3 %v242_v14  ;;  %v85_v26 = vld [vmem:[#allocation2 + $0x58] sm:$0xff]  ;;  %v232_v27 = vld [vmem:[#allocation7 + $0x20] sm:$0xff]  ;;  %v230_v29 = vld [vmem:[#allocation7 + $0x10] sm:$0xff] }
  0x19   :  { %250 = vmatpush.msra.mxu1 %v241_v15  ;;  %v231_v28 = vld [vmem:[#allocation7 + $0x18] sm:$0xff]  ;;  %v86_v30 = vld [vmem:[#allocation2 + $0x60] sm:$0xff]  ;;  %v229_v31 = vld [vmem:[#allocation7 + $0x8] sm:$0xff] }
  0x1a   :  { %417 = vmatpush.msra.mxu3 %v241_v15  ;;  %v228_v32 = vld [vmem:[#allocation7] sm:$0xff]  ;;  %v87_v33 = vld [vmem:[#allocation2 + $0x68] sm:$0xff]  ;;  %v88_v34 = vld [vmem:[#allocation2 + $0x70] sm:$0xff] }
  0x1b   :  { %251 = vmatpush.msra.mxu1 %v240_v17  ;;  %v89_v35 = vld [vmem:[#allocation2 + $0x78] sm:$0xff]  ;;  %v440_v36 = vld [vmem:[%s641_s2] ss:$0 sm:$0xff] }
  0x1c   :  { %418 = vmatpush.msra.mxu3 %v240_v17 }
  0x1d   :  { %252 = vmatpush.msra.mxu1 %v239_v18 }
  0x1e   :  { %419 = vmatpush.msra.mxu3 %v239_v18 }
  0x1f   :  { %400 = vmatmul.msk.f32.gmra.mxu0 %vm98_vm0, %v75_v5  ;;  %253 = vmatpush.msra.mxu1 %v238_v19 }
  0x20   :  { %420 = vmatpush.msra.mxu3 %v238_v19 }
  0x21   :  { %254 = vmatpush.msra.mxu1 %v237_v20 }
  0x22   :  { %421 = vmatpush.msra.mxu3 %v237_v20 }
  0x23   :  { %255 = vmatpush.msra.mxu1 %v236_v22 }
  0x24   :  { %422 = vmatpush.msra.mxu3 %v236_v22 }
  0x25   :  { %256 = vmatpush.msra.mxu1 %v235_v23 }
  0x26   :  { %423 = vmatpush.msra.mxu3 %v235_v23 }
  0x27   :  { %401 = vmatmul.msk.f32.gmra.mxu0 %vm98_vm0, %v76_v6  ;;  %257 = vmatpush.msra.mxu1 %v234_v24 }
  0x28   :  { %424 = vmatpush.msra.mxu3 %v234_v24 }
  0x29   :  { %258 = vmatpush.msra.mxu1 %v233_v25 }
  0x2a   :  { %425 = vmatpush.msra.mxu3 %v233_v25 }
  0x2b   :  { %259 = vmatpush.msra.mxu1 %v232_v27 }
  0x2c   :  { %426 = vmatpush.msra.mxu3 %v232_v27 }
  0x2d   :  { %260 = vmatpush.msra.mxu1 %v231_v28 }
  0x2e   :  { %427 = vmatpush.msra.mxu3 %v231_v28 }
  0x2f   :  { %402 = vmatmul.msk.f32.gmra.mxu0 %vm98_vm0, %v77_v7  ;;  %261 = vmatpush.msra.mxu1 %v230_v29 }
  0x30   :  { %428 = vmatpush.msra.mxu3 %v230_v29 }
  0x31   :  { %262 = vmatpush.msra.mxu1 %v229_v31 }
  0x32   :  { %429 = vmatpush.msra.mxu3 %v229_v31 }
  0x33   :  { %263 = vmatpush.msra.mxu1 %v228_v32 }
  0x34   :  { %430 = vmatpush.msra.mxu3 %v228_v32 }
  0x37   :  { %403 = vmatmul.msk.f32.gmra.mxu0 %vm98_vm0, %v78_v8 }
  0x3f   :  { %404 = vmatmul.msk.f32.gmra.mxu0 %vm98_vm0, %v79_v9 }
  0x47   :  { %405 = vmatmul.msk.f32.gmra.mxu0 %vm98_vm0, %v80_v10 }
  0x4f   :  { %406 = vmatmul.msk.f32.gmra.mxu0 %vm98_vm0, %v81_v11 }
  0x57   :  { %407 = vmatmul.msk.f32.gmra.mxu0 %vm98_vm0, %v82_v12 }
  0x5f   :  { %408 = vmatmul.msk.f32.gmra.mxu0 %vm98_vm0, %v83_v16 }
  0x67   :  { %409 = vmatmul.msk.f32.gmra.mxu0 %vm98_vm0, %v84_v21 }
  0x6f   :  { %410 = vmatmul.msk.f32.gmra.mxu0 %vm98_vm0, %v85_v26 }
  0x77   :  { %411 = vmatmul.msk.f32.gmra.mxu0 %vm98_vm0, %v86_v30 }
  0x7f   :  { %412 = vmatmul.msk.f32.gmra.mxu0 %vm98_vm0, %v87_v33  ;;  %v441_v33 = vld [vmem:[%s643_s4] ss:$0 sm:$0xff] }
  0x87   :  { %413 = vmatmul.msk.f32.gmra.mxu0 %vm98_vm0, %v88_v34 }
  0x8f   :  { %414 = vmatmul.msk.f32.gmra.mxu0 %vm98_vm0, %v89_v35 }
  0x94   :  { %v164_v37 = vpop.f32.mrf.mxu0 }
  0x95   :  { %v165_v38 = vadd.f32 %v440_v36, %v164_v37 }
  0x97   :  { %v212_v39 = vmax.f32 %v165_v38, 0.0 }
  0x99   :  { %264 = vmatmul.f32.vlgmr.msra.gmra.mxu1 %v212_v39 }
  0x9c   :  { %v167_v40 = vpop.f32.mrf.mxu0 }
  0x9d   :  { %v168_v41 = vadd.f32 %v440_v36, %v167_v40 }
  0x9f   :  { %v213_v42 = vmax.f32 %v168_v41, 0.0 }
  0xa1   :  { %267 = vmatmul.f32.gmra.mxu1 %v213_v42 }
  0xa4   :  { %v170_v43 = vpop.f32.mrf.mxu0 }
  0xa5   :  { %v171_v44 = vadd.f32 %v440_v36, %v170_v43 }
  0xa7   :  { %v214_v45 = vmax.f32 %v171_v44, 0.0 }
  0xa9   :  { %270 = vmatmul.f32.gmra.mxu1 %v214_v45 }
  0xac   :  { %v173_v46 = vpop.f32.mrf.mxu0 }
  0xad   :  { %v174_v47 = vadd.f32 %v440_v36, %v173_v46 }
  0xaf   :  { %v215_v48 = vmax.f32 %v174_v47, 0.0 }
  0xb1   :  { %273 = vmatmul.f32.gmra.mxu1 %v215_v48 }
  0xb4   :  { %v176_v49 = vpop.f32.mrf.mxu0 }
  0xb5   :  { %v177_v50 = vadd.f32 %v440_v36, %v176_v49 }
  0xb7   :  { %v216_v51 = vmax.f32 %v177_v50, 0.0 }
  0xb9   :  { %276 = vmatmul.f32.gmra.mxu1 %v216_v51 }
  0xbc   :  { %v179_v52 = vpop.f32.mrf.mxu0 }
  0xbd   :  { %v180_v53 = vadd.f32 %v440_v36, %v179_v52 }
  0xbf   :  { %v217_v54 = vmax.f32 %v180_v53, 0.0 }
  0xc1   :  { %279 = vmatmul.f32.gmra.mxu1 %v217_v54 }
  0xc4   :  { %v182_v55 = vpop.f32.mrf.mxu0 }
  0xc5   :  { %v183_v56 = vadd.f32 %v440_v36, %v182_v55 }
  0xc7   :  { %v218_v57 = vmax.f32 %v183_v56, 0.0 }
  0xc9   :  { %282 = vmatmul.f32.gmra.mxu1 %v218_v57  ;;  %v330_v57 = vld [vmem:[%s645_s6] sm:$0xff] }
  0xcc   :  { %v185_v58 = vpop.f32.mrf.mxu0 }
  0xcd   :  { %v186_v59 = vadd.f32 %v440_v36, %v185_v58  ;;  %v553_v58 = vmov 0  }
  0xce   :  { %439 = vset.pattern.permute.xlu0 %v553_v58 }
  0xcf   :  { %v219_v60 = vmax.f32 %v186_v59, 0.0  ;;  %333 = vperm.xlu0 %439, %v330_v57  }
  0xd1   :  { %285 = vmatmul.f32.gmra.mxu1 %v219_v60 }
  0xd4   :  { %v188_v61 = vpop.f32.mrf.mxu0 }
  0xd5   :  { %v189_v62 = vadd.f32 %v440_v36, %v188_v61 }
  0xd7   :  { %v220_v63 = vmax.f32 %v189_v62, 0.0 }
  0xd9   :  { %288 = vmatmul.f32.gmra.mxu1 %v220_v63 }
  0xdc   :  { %v191_v0 = vpop.f32.mrf.mxu0 }
  0xdd   :  { %v192_v1 = vadd.f32 %v440_v36, %v191_v0 }
  0xdf   :  { %v221_v2 = vmax.f32 %v192_v1, 0.0 }
  0xe1   :  { %291 = vmatmul.f32.vlgmr.msra.gmra.mxu3 %v221_v2 }
  0xe4   :  { %v194_v3 = vpop.f32.mrf.mxu0 }
  0xe5   :  { %v195_v4 = vadd.f32 %v440_v36, %v194_v3 }
  0xe7   :  { %v222_v5 = vmax.f32 %v195_v4, 0.0 }
  0xe9   :  { %294 = vmatmul.f32.gmra.mxu3 %v222_v5 }
  0xec   :  { %v197_v6 = vpop.f32.mrf.mxu0 }
  0xed   :  { %v198_v7 = vadd.f32 %v440_v36, %v197_v6 }
  0xef   :  { %v223_v8 = vmax.f32 %v198_v7, 0.0 }
  0xf1   :  { %297 = vmatmul.f32.gmra.mxu3 %v223_v8  ;;  %v329_v8 = vld [vmem:[%s644_s5] sm:$0xff]  ;;  %s555_s5 = smov [#allocation8]  }
  0xf2   :  { %s386_s20 = sshll.u32 %s555_s5, 4  ;;  %s387_s20 = int_to_ptr.vmem [resolvable:$true] %s386_s20 }
  0xf4   :  { %v200_v9 = vpop.f32.mrf.mxu0 }
  0xf5   :  { %v201_v10 = vadd.f32 %v440_v36, %v200_v9 }
  0xf7   :  { %v224_v11 = vmax.f32 %v201_v10, 0.0 }
  0xf9   :  { %300 = vmatmul.f32.gmra.mxu3 %v224_v11 }
  0xfc   :  { %v203_v12 = vpop.f32.mrf.mxu0 }
  0xfd   :  { %v204_v13 = vadd.f32 %v440_v36, %v203_v12 }
  0xff   :  { %v225_v14 = vmax.f32 %v204_v13, 0.0 }
 0x101   :  { %303 = vmatmul.f32.gmra.mxu3 %v225_v14 }
 0x104   :  { %v206_v15 = vpop.f32.mrf.mxu0 }
 0x105   :  { %v207_v16 = vadd.f32 %v440_v36, %v206_v15  ;;  %v356_v15 = vlaneseq }
 0x107   :  { %v226_v17 = vmax.f32 %v207_v16, 0.0 }
 0x109   :  { %306 = vmatmul.f32.gmra.mxu3 %v226_v17 }
 0x10c   :  { %v209_v18 = vpop.f32.mrf.mxu0 }
 0x10d   :  { %v210_v19 = vadd.f32 %v440_v36, %v209_v18 }
 0x10f   :  { %v227_v20 = vmax.f32 %v210_v19, 0.0  ;;  %v357_v19 = vshrl.u32 %v356_v15, 7 }
 0x111   :  { %309 = vmatmul.f32.gmra.mxu3 %v227_v20  ;;  %vm373_vm1 = vcmp.eq.s32.totalorder %v357_v19, 1  ;;  %vm374_vm2 = vcmp.eq.s32.totalorder %v357_v19, 2  ;;  %vm377_vm5 = vcmp.eq.s32.totalorder %v357_v19, 0 }
 0x112   :  { %vm375_vm3 = vmor %vm373_vm1, %vm374_vm2 }
 0x116   :  { %v624_v21 = vpop.f32.mrf.mxu1 }
 0x117   :  { %v266_v5 = vadd.f32 %v441_v33, %v624_v21 }
 0x119   :  { %v313_v7 = vmax.f32 %v266_v5, 0.0 }
 0x11e   :  { %v268_v23 = vpop.f32.mrf.mxu1 }
 0x11f   :  { %v269_v3 = vadd.f32 %v441_v33, %v268_v23 }
 0x121   :  { %v314_v6 = vmax.f32 %v269_v3, 0.0 }
 0x126   :  { %v271_v25 = vpop.f32.mrf.mxu1 }
 0x127   :  { %v272_v1 = vadd.f32 %v441_v33, %v271_v25 }
 0x129   :  { %v315_v4 = vmax.f32 %v272_v1, 0.0 }
 0x12e   :  { %v274_v27 = vpop.f32.mrf.mxu1 }
 0x12f   :  { %v275_v63 = vadd.f32 %v441_v33, %v274_v27  ;;  %v554_v27 = vmov 0.0  }
 0x131   :  { %v316_v2 = vmax.f32 %v275_v63, 0.0 }
 0x136   :  { %v277_v29 = vpop.f32.mrf.mxu1 }
 0x137   :  { %v278_v61 = vadd.f32 %v441_v33, %v277_v29 }
 0x139   :  { %v317_v0 = vmax.f32 %v278_v61, 0.0 }
 0x13e   :  { %v280_v32 = vpop.f32.mrf.mxu1 }
 0x13f   :  { %v281_v59 = vadd.f32 %v441_v33, %v280_v32 }
 0x141   :  { %v318_v62 = vmax.f32 %v281_v59, 0.0  ;;  %v334_v9 = vpop.permute.xlu0 %333 }
 0x146   :  { %v283_v38 = vpop.f32.mrf.mxu1 }
 0x147   :  { %v284_v55 = vadd.f32 %v441_v33, %v283_v38 }
 0x149   :  { %v319_v60 = vmax.f32 %v284_v55, 0.0 }
 0x14e   :  { %v286_v43 = vpop.f32.mrf.mxu1 }
 0x14f   :  { %v287_v53 = vadd.f32 %v441_v33, %v286_v43 }
 0x151   :  { %v320_v56 = vmax.f32 %v287_v53, 0.0 }
 0x156   :  { %v289_v50 = vpop.f32.mrf.mxu1 }
 0x157   :  { %v290_v51 = vadd.f32 %v441_v33, %v289_v50 }
 0x159   :  { %v321_v54 = vmax.f32 %v290_v51, 0.0 }
 0x164   :  { %v292_v22 = vpop.f32.mrf.mxu3 }
 0x165   :  { %v293_v48 = vadd.f32 %v441_v33, %v292_v22 }
 0x167   :  { %v322_v52 = vmax.f32 %v293_v48, 0.0 }
 0x16c   :  { %v295_v24 = vpop.f32.mrf.mxu3 }
 0x16d   :  { %v296_v46 = vadd.f32 %v441_v33, %v295_v24 }
 0x16f   :  { %v323_v49 = vmax.f32 %v296_v46, 0.0 }
 0x174   :  { %v298_v26 = vpop.f32.mrf.mxu3 }
 0x175   :  { %v299_v44 = vadd.f32 %v441_v33, %v298_v26 }
 0x177   :  { %v324_v47 = vmax.f32 %v299_v44, 0.0 }
 0x17c   :  { %v301_v28 = vpop.f32.mrf.mxu3 }
 0x17d   :  { %v302_v41 = vadd.f32 %v441_v33, %v301_v28  ;;  %v376_v28 = vsel %vm375_vm3, 1.0, %v554_v27 }
 0x17f   :  { %v325_v45 = vmax.f32 %v302_v41, 0.0 }
 0x184   :  { %v304_v30 = vpop.f32.mrf.mxu3 }
 0x185   :  { %v305_v39 = vadd.f32 %v441_v33, %v304_v30 }
 0x187   :  { %v326_v42 = vmax.f32 %v305_v39, 0.0 }
 0x18c   :  { %v307_v31 = vpop.f32.mrf.mxu3 }
 0x18d   :  { %v308_v36 = vadd.f32 %v441_v33, %v307_v31 }
 0x18f   :  { %v327_v40 = vmax.f32 %v308_v36, 0.0 }
 0x194   :  { %v310_v34 = vpop.f32.mrf.mxu3 }
 0x195   :  { %v311_v35 = vadd.f32 %v441_v33, %v310_v34 }
 0x197   :  { %v328_v37 = vmax.f32 %v311_v35, 0.0 }
 0x199   :  { %336 = vmatpush.xpose.msra.mxu2 %v328_v37 }
 0x19d   :  { %337 = vmatpush.xpose.msra.mxu2 %v327_v40 }
 0x1a1   :  { %338 = vmatpush.xpose.msra.mxu2 %v326_v42 }
 0x1a5   :  { %339 = vmatpush.xpose.msra.mxu2 %v325_v45 }
 0x1a9   :  { %340 = vmatpush.xpose.msra.mxu2 %v324_v47 }
 0x1ad   :  { %341 = vmatpush.xpose.msra.mxu2 %v323_v49 }
 0x1b1   :  { %342 = vmatpush.xpose.msra.mxu2 %v322_v52 }
 0x1b5   :  { %343 = vmatpush.xpose.msra.mxu2 %v321_v54 }
 0x1b9   :  { %344 = vmatpush.xpose.msra.mxu2 %v320_v56 }
 0x1bd   :  { %345 = vmatpush.xpose.msra.mxu2 %v319_v60 }
 0x1c1   :  { %346 = vmatpush.xpose.msra.mxu2 %v318_v62 }
 0x1c5   :  { %347 = vmatpush.xpose.msra.mxu2 %v317_v0 }
 0x1c9   :  { %348 = vmatpush.xpose.msra.mxu2 %v316_v2 }
 0x1cd   :  { %349 = vmatpush.xpose.msra.mxu2 %v315_v4 }
 0x1d1   :  { %350 = vmatpush.xpose.msra.mxu2 %v314_v6 }
 0x1d5   :  { %351 = vmatpush.xpose.msra.mxu2 %v313_v7 }
 0x1d8   :  { %352 = vmatmul.f32.vlgmr.msra.gmra.mxu2 %v329_v8 }
 0x25b   :  { %v353_v10 = vpop.f32.mrf.mxu2 }
 0x25c   :  { %v354_v11 = vadd.f32 %v353_v10, %v334_v9 }
 0x25e   :  { %v359_v12 = vand.u32 2147483647, %v354_v11  ;;  %v358_v25 = vmax.f32 %v354_v11, 0.0 }
 0x260   :  { %v360_v13 = vsub.f32 0.0, %v359_v12 }
 0x262   :  { %v361_v14 = vmul.f32 1.442695, %v360_v13 }
 0x264   :  { %442 = vpow2.f32 %v361_v14 }
 0x26a   :  { %v443_v16 = vpop.eup %442 }
 0x26b   :  { %v363_v17 = vadd.f32 1.0, %v443_v16  ;;  %v366_v18 = vmul.f32 -0.5, %v443_v16  ;;  %v369_v21 = vand.u32 2147483647, %v443_v16 }
 0x26d   :  { %444 = vlog2.f32 %v363_v17  ;;  %v367_v20 = vadd.f32 1.0, %v366_v18  ;;  %vm370_vm4 = vcmp.lt.f32.partialorder %v369_v21, 0.0004427343 }
 0x26f   :  { %v368_v24 = vmul.f32 %v443_v16, %v367_v20 }
 0x273   :  { %v445_v22 = vpop.eup %444 }
 0x274   :  { %v365_v23 = vmul.f32 0.6931472, %v445_v22 }
 0x276   :  { %v371_v26 = vsel %vm370_vm4, %v368_v24, %v365_v23 }
 0x277   :  { %v372_v29 = vadd.f32 %v371_v26, %v358_v25 }
 0x279   :  { %v378_v30 = vadd.f32 %v376_v28, %v372_v29 }
 0x27b   :  { %v379_v31 = vsel %vm377_vm5, %v354_v11, %v378_v30 }
 0x27c   :  { %380 = vst [vmem:[#allocation8] sm:$0xff] %v379_v31 }
 0x27d   :  { %391 = dma.vmem_to_hbm [thread:$0]  %s387_s20, 128, %s389_s23, [#allocation4]  }
 0x27e   :  { %546 = dma.done.wait [#allocation4], 128  }
 0x27f   :  { %547 = vsyncadd [#allocation4], 4294967168 }
 0x280   :  { %396 = vsyncpa [#allocation3], 1 }
 0x281   :  { %397 = vsyncpa [#allocation6], 1 }
 0x282   :  { %398 = vsyncpa [#allocation4], 1 }

</bundles_post_ra>
